<compile_context>
chip_gen: v5e
topology: v5e:2x2
jax: 0.10.0
libtpu: 0.0.40
codegen_flags: <defaults>
</compile_context>

<pallas_src>
import functools
import math

import jax
import jax.numpy as jnp
from jax.experimental import pallas as pl
from jax.experimental.pallas import tpu as pltpu


# -----------------------------------------------------------------------------
# Kernels
# -----------------------------------------------------------------------------
def _pe_add_kernel(x_ref, pe_ref, o_ref):
    # o = x + pe ; pe block is (1, tR, C) and broadcasts over the batch block.
    o_ref[...] = (x_ref[...] + pe_ref[...]).astype(o_ref.dtype)


def _pe_add_dropout_kernel(thresh, inv_keep, seed_ref, x_ref, pe_ref, o_ref):
    # o = inverted_dropout(x + pe) with a stateless counter-based hash PRNG.
    # NOTE: random stream differs from torch.nn.Dropout (stochastic op anyway).
    # Math stays in the input dtype (bf16 stays bf16); only the hash is uint32.
    y = x_ref[...] + pe_ref[...]

    # Per-grid-step salt (scalar ops, negligible cost).
    step = pl.program_id(0) * pl.num_programs(1) + pl.program_id(1)
    salt = (seed_ref[0].astype(jnp.uint32)
            + step.astype(jnp.uint32) * jnp.uint32(2654435761))
    salt = salt ^ (salt >> jnp.uint32(16))
    salt = salt * jnp.uint32(0x045D9F3B)

    shape = x_ref.shape                                     # (bB, tR, C), static
    bb = jax.lax.broadcasted_iota(jnp.int32, shape, 0)
    row = jax.lax.broadcasted_iota(jnp.int32, shape, 1)
    col = jax.lax.broadcasted_iota(jnp.int32, shape, 2)
    idx = ((bb * shape[1] + row) * shape[2] + col).astype(jnp.uint32)

    # Two-round mix (mul + xorshift each) -- adequate mask quality for dropout.
    r = idx ^ salt
    r = r * jnp.uint32(0x7FEB352D)
    r = r ^ (r >> jnp.uint32(15))
    r = r * jnp.uint32(0x846CA68B)
    r = r ^ (r >> jnp.uint32(16))

    # Top 24 bits -> int32, integer threshold compare (no f32 convert / divide).
    rb = (r >> jnp.uint32(8)).astype(jnp.int32)
    keep = rb < jnp.int32(thresh)

    o_ref[...] = jnp.where(keep, y * inv_keep, 0.0).astype(o_ref.dtype)


# -----------------------------------------------------------------------------
# Parameter / buffer construction (deterministic, mirrors torch __init__)
# -----------------------------------------------------------------------------
def make_pe_buffer(seq_len: int, d_model: int, dtype=jnp.float32):
    position = jnp.arange(seq_len, dtype=jnp.float32)[:, None]            # (S, 1)
    div_term = jnp.exp(
        jnp.arange(0, d_model, 2, dtype=jnp.float32) * (-math.log(10000.0) / d_model)
    )                                                                      # (D/2,)
    angles = position * div_term                                           # (S, D/2)
    pe = jnp.zeros((seq_len, d_model), jnp.float32)
    pe = pe.at[:, 0::2].set(jnp.sin(angles))
    pe = pe.at[:, 1::2].set(jnp.cos(angles))
    return pe.astype(dtype)[None]                                          # (1, S, D)


# -----------------------------------------------------------------------------
# Tiling helpers
# -----------------------------------------------------------------------------
def _vmem_budget():
    """Per-generation VMEM limit + per-block byte target."""
    try:
        cap = int(pltpu.get_tpu_info().vmem_capacity_bytes)
    except Exception:
        cap = 64 << 20                      # conservative: v7x has the smallest VMEM
    vmem_limit = min(cap * 3 // 4, 96 << 20)          # headroom for compiler scratch
    # x/out double-buffered (4 blocks) + pe double-buffered (2 blocks <= x block)
    # plus slack -> ~1/8 of the limit per x/out block, capped at 8 MiB.
    target = max(1 << 20, min(vmem_limit // 8, 8 << 20))
    return int(vmem_limit), int(target)


def _block_shape(B, R, C, itemsize, target_bytes):
    """Pick (bB, tR): batch-block and row-block so bB*tR*C*itemsize ~ target."""
    sublane = max(8, 32 // max(itemsize, 1))      # 8 f32, 16 bf16, 32 int8/fp8
    row_bytes = C * itemsize
    if R * row_bytes <= target_bytes:
        tR = R                                             # full row extent
        bB = int(max(1, min(B, target_bytes // max(R * row_bytes, 1))))
    else:
        tR = (target_bytes // row_bytes) // sublane * sublane
        tR = int(min(max(sublane, tR), R))
        bB = 1
    # v7x megacore: if the whole (non-trivial) problem fits in one block, split
    # the batch axis so both TensorCores get balanced work.
    if bB >= B and tR >= R and B >= 2 and B * R * row_bytes > (1 << 20):
        bB = -(-B // 2)
    return int(bB), int(tR)


def _lane_dense_layout(x, pe, S):
    """Return (x_r, pe_r, flat_len): arrays with a lane-dense (multiple-of-128)
    last dim.  flat_len is None when no flatten was needed, otherwise the
    unpadded flattened length per batch element (for slicing the pad off)."""
    B, _, D = x.shape
    if D % 128 == 0:
        # Pass the full pe buffer; the BlockSpec windows only the first S rows.
        return x, pe.astype(x.dtype), None
    L = S * D
    Lp = -(-L // 128) * 128
    x_f = x.reshape(B, L)
    pe_f = pe[:, :S, :].astype(x.dtype).reshape(1, L)
    if Lp != L:
        # Pad up to a 128 multiple so stores are unmasked; pad is sliced off.
        x_f = jnp.pad(x_f, ((0, 0), (0, Lp - L)))
        pe_f = jnp.pad(pe_f, ((0, 0), (0, Lp - L)))
    return x_f.reshape(B, Lp // 128, 128), pe_f.reshape(1, Lp // 128, 128), L


# -----------------------------------------------------------------------------
# Forward wrapper
# -----------------------------------------------------------------------------
def positional_encoding_forward(x, pe, *, dropout_p=0.0, training=False, seed=0):
    B, S, D = x.shape
    xr, per, flat_len = _lane_dense_layout(x, pe, S)
    R, C = xr.shape[1], xr.shape[2]

    itemsize = jnp.dtype(x.dtype).itemsize
    vmem_limit, target_bytes = _vmem_budget()
    bB, tR = _block_shape(B, R, C, itemsize, target_bytes)
    grid = (pl.cdiv(R, tR), pl.cdiv(B, bB))   # batch innermost -> pe tile resident

    out_shape = jax.ShapeDtypeStruct((B, R, C), x.dtype)
    compiler_params = pltpu.CompilerParams(
        dimension_semantics=("parallel", "parallel"),   # megacore-friendly (v7x)
        vmem_limit_bytes=vmem_limit,
    )
    use_dropout = training and dropout_p > 0.0
    cost = pl.CostEstimate(
        flops=int((2 if use_dropout else 1) * B * R * C),
        transcendentals=0,
        bytes_accessed=int((2 * B + 1) * R * C * itemsize),
    )

    if use_dropout:
        keep = 1.0 - float(dropout_p)
        thresh = min(int(keep * (1 << 24)), (1 << 24) - 1)   # top-24-bit threshold
        inv_keep = 1.0 / keep
        kernel = functools.partial(_pe_add_dropout_kernel, thresh, inv_keep)
        seed_arr = jnp.asarray([seed], jnp.int32)
        y = pl.pallas_call(
            kernel,
            out_shape=out_shape,
            grid_spec=pltpu.PrefetchScalarGridSpec(
                num_scalar_prefetch=1,
                grid=grid,
                in_specs=[
                    pl.BlockSpec((bB, tR, C), lambda r, b, *_: (b, r, 0)),
                    pl.BlockSpec((1, tR, C), lambda r, b, *_: (0, r, 0)),
                ],
                out_specs=pl.BlockSpec((bB, tR, C), lambda r, b, *_: (b, r, 0)),
            ),
            compiler_params=compiler_params,
            cost_estimate=cost,
        )(seed_arr, xr, per)
    else:
        # eval mode (or p == 0): dropout is identity
        y = pl.pallas_call(
            _pe_add_kernel,
            out_shape=out_shape,
            grid_spec=pltpu.PrefetchScalarGridSpec(
                num_scalar_prefetch=0,
                grid=grid,
                in_specs=[
                    pl.BlockSpec((bB, tR, C), lambda r, b: (b, r, 0)),
                    pl.BlockSpec((1, tR, C), lambda r, b: (0, r, 0)),
                ],
                out_specs=pl.BlockSpec((bB, tR, C), lambda r, b: (b, r, 0)),
            ),
            compiler_params=compiler_params,
            cost_estimate=cost,
        )(xr, per)

    if flat_len is None:
        return y
    return y.reshape(B, -1)[:, :flat_len].reshape(B, S, D)


# -----------------------------------------------------------------------------
# Demo / self-test
# -----------------------------------------------------------------------------
if __name__ == "__main__":
    d_model, seq_len, batch = 32, 8, 2
    dropout_p = 0.1

    key = jax.random.PRNGKey(0)
    x = jax.random.normal(key, (batch, seq_len, d_model), dtype=jnp.float32)
    pe = make_pe_buffer(seq_len, d_model)

    # ---- eval mode (dropout = identity): must match x + pe exactly ----
    y_eval = positional_encoding_forward(x, pe, dropout_p=dropout_p, training=False)
    y_eval = jax.block_until_ready(y_eval)
    ref = x + pe[:, :seq_len, :]
    assert y_eval.shape == x.shape and y_eval.dtype == x.dtype
    assert jnp.allclose(y_eval, ref, atol=1e-6, rtol=1e-6)

    # ---- training mode: inverted dropout, surviving values = (x+pe)/keep ----
    y_train = positional_encoding_forward(
        x, pe, dropout_p=dropout_p, training=True, seed=123)
    y_train = jax.block_until_ready(y_train)
    keep = 1.0 - dropout_p
    kept = y_train != 0.0
    assert jnp.allclose(jnp.where(kept, y_train * keep, ref), ref,
                        atol=1e-5, rtol=1e-5)
    frac_kept = float(jnp.mean(kept.astype(jnp.float32)))
    assert 0.5 < frac_kept <= 1.0

    # ---- exercise the pad-to-128 fallback (D<128, S*D not a 128 multiple) ----
    d2, s2 = 20, 5
    x2 = jax.random.normal(jax.random.PRNGKey(1), (batch, s2, d2), jnp.float32)
    pe2 = make_pe_buffer(s2, d2)
    y2 = jax.block_until_ready(
        positional_encoding_forward(x2, pe2, dropout_p=0.0, training=False))
    assert y2.shape == x2.shape
    assert jnp.allclose(y2, x2 + pe2[:, :s2, :], atol=1e-6, rtol=1e-6)

    print("KERNEL_OK")
</pallas_src>

<mosaic_0001>
module attributes {stable_mosaic.version = 11 : i64} {
  func.func @_pe_add_kernel(%arg0: i32, %arg1: i32, %arg2: memref<2x2x128xf32, #tpu.memory_space<vmem>>, %arg3: memref<1x2x128xf32, #tpu.memory_space<vmem>>, %arg4: memref<2x2x128xf32, #tpu.memory_space<vmem>>) attributes {dimension_semantics = [#tpu.dimension_semantics<parallel>, #tpu.dimension_semantics<parallel>], iteration_bounds = array<i64: 1, 1>, scalar_prefetch = 0 : i64, scratch_operands = 0 : i64, tpu.core_type = #tpu.core_type<tc>, window_params = [{transform_indices = @transform_0, window_bounds = array<i64: 2, 2, 128>}, {transform_indices = @transform_1, window_bounds = array<i64: 1, 2, 128>}, {transform_indices = @transform_2, window_bounds = array<i64: 2, 2, 128>}]} {
    %c0 = arith.constant 0 : index
    %c0_0 = arith.constant 0 : index
    %c0_1 = arith.constant 0 : index
    %0 = vector.load %arg2[%c0, %c0_0, %c0_1] : memref<2x2x128xf32, #tpu.memory_space<vmem>>, vector<2x2x128xf32>
    %c0_2 = arith.constant 0 : index
    %c0_3 = arith.constant 0 : index
    %c0_4 = arith.constant 0 : index
    %1 = vector.load %arg3[%c0_2, %c0_3, %c0_4] : memref<1x2x128xf32, #tpu.memory_space<vmem>>, vector<1x2x128xf32>
    %2 = vector.broadcast %1 : vector<1x2x128xf32> to vector<2x2x128xf32>
    %3 = arith.addf %0, %2 : vector<2x2x128xf32>
    %c0_5 = arith.constant 0 : index
    %c0_6 = arith.constant 0 : index
    %c0_7 = arith.constant 0 : index
    %4 = vector.load %arg4[%c0_5, %c0_6, %c0_7] : memref<2x2x128xf32, #tpu.memory_space<vmem>>, vector<2x2x128xf32>
    tpu.vector_store %arg4[%c0_5, %c0_6, %c0_7], %3 {strides = array<i32>} : memref<2x2x128xf32, #tpu.memory_space<vmem>>, vector<2x2x128xf32>,
    return
  }
  func.func @transform_0(%arg0: i32, %arg1: i32) -> (i32, i32, i32) {
    %c0_i32 = arith.constant 0 : i32
    %c0_i32_0 = arith.constant 0 : i32
    return %arg1, %arg0, %c0_i32 : i32, i32, i32
  }
  func.func @transform_1(%arg0: i32, %arg1: i32) -> (i32, i32, i32) {
    %c0_i32 = arith.constant 0 : i32
    %c0_i32_0 = arith.constant 0 : i32
    %c0_i32_1 = arith.constant 0 : i32
    return %c0_i32, %arg0, %c0_i32_0 : i32, i32, i32
  }
  func.func @transform_2(%arg0: i32, %arg1: i32) -> (i32, i32, i32) {
    %c0_i32 = arith.constant 0 : i32
    %c0_i32_0 = arith.constant 0 : i32
    return %arg1, %arg0, %c0_i32 : i32, i32, i32
  }
}

</mosaic_0001>

<bundles_post_ra>
// kernel: tpu_custom_call.1
= control target key start
LH: loop header
LB: loop body
LE: loop exit
PB: predicated region body
PF: predicated region fallthrough
CT: control target
= control target key end

     0   :  { %7 = vsyncpa [#allocation3], 0  ;;  %s181_s0 = inlined_call_operand.hbm [shape: f32[2,2,128], index: 0, kind: input, shape index: {}]   ;;  %s182_s1 = inlined_call_operand.hbm [shape: f32[1,2,128], index: 1, kind: input, shape index: {}]   ;;  %s183_s2 = inlined_call_operand.hbm [shape: f32[2,2,128], index: 2, kind: output, shape index: {}]  }
   0x1   :  { %8 = vsyncpa [#allocation6], 0 }
   0x2   :  { %9 = vsyncpa [#allocation4], 0  ;;  %s14_s11 = sshll.u32 %s181_s0, 4  ;;  %s152_s12 = smov [#allocation2]   ;;  %s15_s11 = int_to_ptr.hbm [resolvable:$true] %s14_s11 }
   0x3   :  { %s16_s13 = sshll.u32 %s152_s12, 4  ;;  %s28_s16 = sshll.u32 %s182_s1, 4  ;;  %s17_s13 = int_to_ptr.vmem [resolvable:$true] %s16_s13  ;;  %s29_s16 = int_to_ptr.hbm [resolvable:$true] %s28_s16 }
   0x4   :  { %s153_s17 = smov 32   ;;  %s154_s18 = smov 2  }
   0x5   :  { %22 = dma.hbm_to_vmem [thread:$0]  %s15_s11, 64, %s17_s13, [#allocation3], %s153_s17, %s153_s17, %s154_s18  }
   0x6   :  { %s155_s19 = smov [#allocation5]  }
   0x7   :  { %s30_s20 = sshll.u32 %s155_s19, 4  ;;  %s31_s20 = int_to_ptr.vmem [resolvable:$true] %s30_s20 }
   0x8   :  { %33 = dma.hbm_to_vmem [thread:$0]  %s29_s16, 32, %s31_s20, [#allocation6]  }
   0x9   :  { %146 = dma.done.wait [#allocation3], 64  }
   0xa   :  { %147 = vsyncadd [#allocation3], 4294967232 }
   0xb   :  { %148 = dma.done.wait [#allocation6], 32  }
   0xc   :  { %149 = vsyncadd [#allocation6], 4294967264  ;;  %s156_s0 = smov [#allocation7]   ;;  %s55_s24 = sshll.u32 %s183_s2, 4  ;;  %v42_v0 = vld [vmem:[#allocation2] sm:$0x3]  ;;  %s56_s24 = int_to_ptr.hbm [resolvable:$true] %s55_s24 }
   0xd   :  { %s53_s21 = sshll.u32 %s156_s0, 4  ;;  %v44_v1 = vld [vmem:[#allocation5] sm:$0x3]  ;;  %v43_v2 = vld [vmem:[#allocation2 + $0x2] sm:$0x3]  ;;  %s54_s21 = int_to_ptr.vmem [resolvable:$true] %s53_s21 }
   0xe   :  { %v45_v3 = vadd.f32 %v44_v1, %v42_v0  ;;  %v46_v4 = vadd.f32 %v44_v1, %v43_v2 }
  0x10   :  { %47 = vst [vmem:[#allocation7] sm:$0x3] %v45_v3 }
  0x11   :  { %48 = vst [vmem:[#allocation7 + $0x2] sm:$0x3] %v46_v4 }
  0x12   :  { %61 = dma.vmem_to_hbm [thread:$0]  %s54_s21, 64, %s56_s24, [#allocation4], %s153_s17, %s153_s17, %s154_s18  }
  0x13   :  { %150 = dma.done.wait [#allocation4], 64  }
  0x14   :  { %151 = vsyncadd [#allocation4], 4294967232 }
  0x15   :  { %66 = vsyncpa [#allocation3], 1 }
  0x16   :  { %67 = vsyncpa [#allocation6], 1 }
  0x17   :  { %68 = vsyncpa [#allocation4], 1 }

</bundles_post_ra>
